<compile_context>
chip_gen: v7x
topology: tpu7x:2x2x1
jax: 0.10.0
libtpu: 0.0.40
codegen_flags: <defaults>
</compile_context>

<pallas_src>
import functools

import jax
import jax.numpy as jnp
from jax.experimental import pallas as pl
from jax.experimental.pallas import tpu as pltpu


def _shortcut_kernel(x_ref, o_ref, *, pad_before):
    # x_ref: (nb, C, H, W)        NCHW input block (H on sublanes, W on lanes)
    # o_ref: (nb, C_out, H_out, W_out)   C_out = pad_before + C + pad_after
    nb, c, h, w = x_ref.shape
    c_out, h_out, w_out = o_ref.shape[1], o_ref.shape[2], o_ref.shape[3]
    pad_after = c_out - pad_before - c

    # (1) H subsample: stride-2 read on the sublane (second-minor) axis.
    #     (Lane-strided reads are unsupported; sublane stride is the
    #      supported case, so the W subsample is handled separately below.)
    xs = x_ref[:, :, pl.ds(0, h_out, stride=2), :]          # (nb, C, H_out, W)

    # (2) W subsample: tiny one-hot selection matmul with K = W (not H*W).
    #     sel[w, wo] = 1 iff w == 2*wo; built in-kernel -> no HBM operand.
    w_ids = jax.lax.broadcasted_iota(jnp.int32, (w, w_out), 0)
    wo_ids = jax.lax.broadcasted_iota(jnp.int32, (w, w_out), 1)
    if jnp.issubdtype(x_ref.dtype, jnp.floating):
        compute_dtype = x_ref.dtype
    else:
        compute_dtype = jnp.float32          # v7x MXU has no integer datapath
    sel = (w_ids == 2 * wo_ids).astype(compute_dtype)

    # Leading-dim merge only (lane dim W preserved) -> free reshape.
    y = jnp.dot(
        xs.reshape(nb * c * h_out, w).astype(compute_dtype),
        sel,
        preferred_element_type=jnp.float32,
        precision=jax.lax.Precision.HIGHEST,   # exact copy of f32 activations
    )
    y = y.reshape(nb, c, h_out, w_out).astype(o_ref.dtype)

    # (3) Channel zero-padding written directly via slice stores.
    if pad_before > 0:
        o_ref[:, :pad_before, :, :] = jnp.zeros(
            (nb, pad_before, h_out, w_out), o_ref.dtype)
    o_ref[:, pad_before:pad_before + c, :, :] = y
    if pad_after > 0:
        o_ref[:, pad_before + c:, :, :] = jnp.zeros(
            (nb, pad_after, h_out, w_out), o_ref.dtype)


def lambda_layer_shortcut(x, pad_before, pad_after):
    """Pallas equivalent of
    LambdaLayer(lambda x: F.pad(x[:, :, ::2, ::2],
                                (0, 0, 0, 0, pad_before, pad_after),
                                "constant", 0))."""
    N, C, H, W = x.shape
    H_out, W_out = (H + 1) // 2, (W + 1) // 2
    C_out = C + pad_before + pad_after

    itemsize = jnp.dtype(x.dtype).itemsize
    per_img_bytes = (C * H * W + C_out * H_out * W_out) * itemsize

    # ~8 MiB of (input + output) per grid step: long DMAs that amortize the
    # per-step overhead on v6e, while 2x double-buffering (~16 MiB) stays
    # comfortably inside v7x's 64 MiB physical VMEM.
    budget = 8 * 1024 * 1024
    nb = int(max(1, min(N, budget // max(1, per_img_bytes))))

    # v7x megacore: the "parallel" batch axis is how work shards across the
    # two TensorCores -- force >= 2 grid steps and prefer an even count.
    if N > 1:
        steps = max(pl.cdiv(N, nb), 2)
        if steps % 2 == 1 and steps < N:
            steps += 1
        steps = min(steps, N)
        nb = int(pl.cdiv(N, steps))

    grid = (pl.cdiv(N, nb),)

    block_bytes = nb * per_img_bytes
    vmem_limit = int(min(48 * 1024 * 1024,
                         max(32 * 1024 * 1024, 3 * block_bytes)))

    kernel = functools.partial(_shortcut_kernel, pad_before=pad_before)

    return pl.pallas_call(
        kernel,
        out_shape=jax.ShapeDtypeStruct((N, C_out, H_out, W_out), x.dtype),
        grid=grid,
        in_specs=[
            # Last two block dims equal the full array dims -> valid tiling.
            pl.BlockSpec((nb, C, H, W), lambda b: (b, 0, 0, 0)),
        ],
        out_specs=pl.BlockSpec((nb, C_out, H_out, W_out),
                               lambda b: (b, 0, 0, 0)),
        compiler_params=pltpu.CompilerParams(
            dimension_semantics=("parallel",),
            vmem_limit_bytes=vmem_limit,
        ),
    )(x)


if __name__ == "__main__":
    key = jax.random.PRNGKey(0)
    # NCHW input; option-A shortcut pads the channel dim by planes//4 per side.
    N, C, H, W = 2, 4, 16, 16
    pad_before, pad_after = 2, 2

    x = jax.random.normal(key, (N, C, H, W), dtype=jnp.float32)

    out = jax.block_until_ready(lambda_layer_shortcut(x, pad_before, pad_after))

    # Pure-JAX reference of the PyTorch lambda.
    ref = jnp.pad(
        x[:, :, ::2, ::2],
        ((0, 0), (pad_before, pad_after), (0, 0), (0, 0)),
        mode="constant",
        constant_values=0.0,
    )

    assert out.shape == ref.shape, (out.shape, ref.shape)
    # rtol guards the selection matmul's f32 multi-pass rounding while still
    # rejecting any bf16 truncation of the identity path (err ~4e-3 rel).
    assert jnp.allclose(out, ref, rtol=1e-4, atol=1e-6), "mismatch vs reference"
    assert bool(jnp.all(out[:, :pad_before] == 0)), "pad_before not zero"
    assert bool(jnp.all(out[:, pad_before + C:] == 0)), "pad_after not zero"
    print("KERNEL_OK")
</pallas_src>

<mosaic_0001>
module attributes {stable_mosaic.version = 11 : i64} {
  func.func @_shortcut_kernel(%arg0: i32, %arg1: memref<1x4x16x16xf32, #tpu.memory_space<vmem>>, %arg2: memref<1x8x8x8xf32, #tpu.memory_space<vmem>>) attributes {dimension_semantics = [#tpu.dimension_semantics<parallel>], iteration_bounds = array<i64: 2>, scalar_prefetch = 0 : i64, scratch_operands = 0 : i64, tpu.core_type = #tpu.core_type<tc>, window_params = [{transform_indices = @transform_0, window_bounds = array<i64: 1, 4, 16, 16>}, {transform_indices = @transform_1, window_bounds = array<i64: 1, 8, 8, 8>}]} {
    %c0 = arith.constant 0 : index
    %c0_0 = arith.constant 0 : index
    %c0_1 = arith.constant 0 : index
    %c0_2 = arith.constant 0 : index
    %0 = tpu.strided_load %arg1[%c0, %c0_0, %c0_1, %c0_2] {strides = array<i32: 1, 1, 2, 1>} : memref<1x4x16x16xf32, #tpu.memory_space<vmem>>, vector<1x4x8x16xf32>
    %1 = tpu.iota {dimensions = array<i32: 0>} : vector<16x8xi32>
    %2 = tpu.iota {dimensions = array<i32: 1>} : vector<16x8xi32>
    %c2_i32 = arith.constant 2 : i32
    %3 = vector.broadcast %c2_i32 : i32 to vector<16x8xi32>
    %4 = arith.muli %3, %2 : vector<16x8xi32>
    %5 = arith.cmpi eq, %1, %4 : vector<16x8xi32>
    %6 = arith.extui %5 : vector<16x8xi1> to vector<16x8xi32>
    %7 = arith.sitofp %6 : vector<16x8xi32> to vector<16x8xf32>
    %8 = vector.shape_cast %0 : vector<1x4x8x16xf32> to vector<32x16xf32>
    %cst = arith.constant dense<0.000000e+00> : vector<32x8xf32>
    %9 = tpu.matmul %8, %7, %cst {dimension_numbers = #tpu.dot_dimension_numbers<[1], [0], [0], [1], [0, 0, 1, 1], [], []>, precision = #tpu.contract_precision<fp32>} : vector<32x16xf32>, vector<16x8xf32>, vector<32x8xf32> -> vector<32x8xf32>
    %10 = vector.shape_cast %9 : vector<32x8xf32> to vector<1x4x8x8xf32>
    %cst_3 = arith.constant 0.000000e+00 : f32
    %11 = vector.broadcast %cst_3 : f32 to vector<1x2x8x8xf32>
    %c0_4 = arith.constant 0 : index
    %c0_5 = arith.constant 0 : index
    %c0_6 = arith.constant 0 : index
    %c0_7 = arith.constant 0 : index
    %12 = vector.load %arg2[%c0_4, %c0_5, %c0_6, %c0_7] : memref<1x8x8x8xf32, #tpu.memory_space<vmem>>, vector<1x2x8x8xf32>
    tpu.vector_store %arg2[%c0_4, %c0_5, %c0_6, %c0_7], %11 {strides = array<i32>} : memref<1x8x8x8xf32, #tpu.memory_space<vmem>>, vector<1x2x8x8xf32>,
    %c0_8 = arith.constant 0 : index
    %c2 = arith.constant 2 : index
    %c0_9 = arith.constant 0 : index
    %c0_10 = arith.constant 0 : index
    %13 = vector.load %arg2[%c0_8, %c2, %c0_9, %c0_10] : memref<1x8x8x8xf32, #tpu.memory_space<vmem>>, vector<1x4x8x8xf32>
    tpu.vector_store %arg2[%c0_8, %c2, %c0_9, %c0_10], %10 {strides = array<i32>} : memref<1x8x8x8xf32, #tpu.memory_space<vmem>>, vector<1x4x8x8xf32>,
    %cst_11 = arith.constant 0.000000e+00 : f32
    %14 = vector.broadcast %cst_11 : f32 to vector<1x2x8x8xf32>
    %c0_12 = arith.constant 0 : index
    %c6 = arith.constant 6 : index
    %c0_13 = arith.constant 0 : index
    %c0_14 = arith.constant 0 : index
    %15 = vector.load %arg2[%c0_12, %c6, %c0_13, %c0_14] : memref<1x8x8x8xf32, #tpu.memory_space<vmem>>, vector<1x2x8x8xf32>
    tpu.vector_store %arg2[%c0_12, %c6, %c0_13, %c0_14], %14 {strides = array<i32>} : memref<1x8x8x8xf32, #tpu.memory_space<vmem>>, vector<1x2x8x8xf32>,
    return
  }
  func.func @transform_0(%arg0: i32) -> (i32, i32, i32, i32) {
    %c0_i32 = arith.constant 0 : i32
    %c0_i32_0 = arith.constant 0 : i32
    %c0_i32_1 = arith.constant 0 : i32
    %c0_i32_2 = arith.constant 0 : i32
    return %arg0, %c0_i32, %c0_i32_0, %c0_i32_1 : i32, i32, i32, i32
  }
  func.func @transform_1(%arg0: i32) -> (i32, i32, i32, i32) {
    %c0_i32 = arith.constant 0 : i32
    %c0_i32_0 = arith.constant 0 : i32
    %c0_i32_1 = arith.constant 0 : i32
    %c0_i32_2 = arith.constant 0 : i32
    return %arg0, %c0_i32, %c0_i32_0, %c0_i32_1 : i32, i32, i32, i32
  }
}

</mosaic_0001>

<bundles_post_ra>
// kernel: tpu_custom_call.1
= control target key start
LH: loop header
LB: loop body
LE: loop exit
PB: predicated region body
PF: predicated region fallthrough
CT: control target
= control target key end

     0   :  { %6 = vsyncpa [#allocation3], 0  ;;  %s1394_s0 = inlined_call_operand.hbm [shape: f32[2,4,16,16], index: 0, kind: input, shape index: {}]   ;;  %s1395_s1 = inlined_call_operand.hbm [shape: f32[2,8,8,8], index: 1, kind: output, shape index: {}]  }
   0x1   :  { %8 = vsyncpa [#allocation3 + $0x1], 0 }
   0x2   :  { %9 = vsyncpa [#allocation4], 0 }
   0x3   :  { %11 = vsyncpa [#allocation4 + $0x1], 0  ;;  %s1194_s6 = smov 0   ;;  %s1196_s7 = smov 0  }
   0x4   :  { %s1198_s8 = smov 0   ;;  %s1200_s9 = smov 0  }
   0x5 LB: > { %s1215_s10 = sadd.s32 4294967295, %s1174_s9   ;;  %s853_s11 = sadd.s32 4294967294, %s1174_s9   ;;  %s1174_s9 = sphi %s1200_s9, %s1410_s9   ;;  %s1170_s8 = sphi %s1198_s8, %s1409_s8   ;;  %s1166_s7 = sphi %s1196_s7, %s1408_s7   ;;  %s1162_s6 = sphi %s1194_s6, %s1407_s6  }
   0x6   : > { %s1219_s12 = sadd.s32 1, %s1174_s9   ;;  %s24_s13 = sadd.s32 1, %s1170_s8 }
   0x7   : > { %s21_s14 = ssub.s32 %s1174_s9, %s1219_s12  ;;  %p31_p0 = scmp.ne.s32.totalorder %s1170_s8, %s1166_s7 }
   0x8   : > { %p22_p1 = scmp.eq.s32.totalorder %s21_s14, 0  ;;  %p32_p2 = scmp.eq.s32.totalorder %s1174_s9, 0 }
   0x9   : > { %p37_p3 = scmp.ne.s32.totalorder %s1166_s7, %s1162_s6  ;;  %p38_p4 = scmp.eq.s32.totalorder %s1215_s10, 0 }
   0xa   : > { %s1231_s15 = scalar_select %p22_p1, %s1170_s8, %s24_s13  }
   0xb   : > { %p1233_p5 = por %p32_p2, %p31_p0  ;;  %p1237_p6 = por %p38_p4, %p37_p3 }
   0xc   : > { %p61_p7 = scmp.eq.s32.totalorder %s1215_s10, 1  ;;  %p67_p8 = scmp.eq.s32.totalorder %s853_s11, 1 }
   0xd   : > { %p1038_p10 = scmp.lt.s32.totalorder %s1174_s9, 2  ;;  %s87_s20 = sand.u32 1, %s1170_s8  }
   0xe   : > { %p1244_p11 = por %p61_p7, %p31_p0  ;;  %p1248_p12 = por %p67_p8, %p37_p3 }
   0xf   : > { %s884_s21 = sshll.u32 %s1174_s9, 10  ;;  %s856_s22 = sshll.u32 %s87_s20, 6 }
  0x10   : > { %s1399_s18 = scalar_select %p1244_p11, 1, 0 }
  0x11   : > { %s1400_s19 = scalar_select %p1248_p12, 1, 0 }
  0x12   : > { %s1257_s25 = scalar_lea.hbm %s1394_s0, %s884_s21  ;;  %s91_s26 = scalar_lea.vmem [#allocation2], %s856_s22 }
  0x13   : > { %s98_s27 = sshll.u32 %s91_s26, 4  ;;  %p1261_p13 = pnand %p1038_p10, %p1233_p5  ;;  %s1265_s27 = int_to_ptr.vmem [resolvable:$true] %s98_s27 }
  0x14   : > { %s1267_s29 = scalar_lea.sflag [#allocation3], %s87_s20  ;;  %s1078_s30 = scalar_lea.hbm %s1257_s25, 1024 }
  0x15   : > { %p1079_p0 = scmp.ne.s32.totalorder %s1257_s25, %s1078_s30  ;;  %p1080_p1 = pneg %p1261_p13 }
  0x16   : > { %s1083_s4 = scalar_lea.hbm %s1394_s0, 2048  ;;  %p1084_p4 = scmp.lt.u32.totalorder %s1257_s25, %s1394_s0 }
  0x17   : > { %p1081_p2 = pnand %p1080_p1, %p1079_p0  ;;  %p1085_p5 = scmp.lt.u32.totalorder %s1083_s4, %s1078_s30 }
  0x18   : > { %p1087_p8 = scmp.lt.u32.totalorder %s1078_s30, %s1257_s25 }
  0x19   : > { %p1082_p3 = pneg %p1081_p2  ;;  %p1086_p7 = por %p1085_p5, %p1084_p4 }
  0x1b   : > { %p1088_p10 = por %p1087_p8, %p1086_p7 }
  0x1d   : > { %p1089_p9 = pnand %p1088_p10, %p1082_p3 }
  0x1f   : > { %1092 = shalt.err (!%p1089_p9)
}
  0x20   : > { %s1093_s13 = scalar_lea.vmem %s1265_s27, 1024  ;;  %s1176_s14 = smov [#allocation2]  }
  0x21   : > { %p1094_p0 = scmp.ne.s32.totalorder %s1265_s27, %s1093_s13  ;;  %s1098_s16 = sshll.u32 %s1176_s14, 4  ;;  %s1099_s16 = int_to_ptr.vmem [resolvable:$false] %s1098_s16 }
  0x22   : > { %s1100_s20 = scalar_lea.vmem %s1099_s16, 2048  ;;  %p1101_p11 = scmp.lt.s32.totalorder %s1265_s27, %s1099_s16 }
  0x23   : > { %p1096_p2 = pnand %p1094_p0, %p1080_p1  ;;  %p1102_p4 = scmp.lt.s32.totalorder %s1100_s20, %s1093_s13 }
  0x25   : > { %p1097_p12 = pneg %p1096_p2  ;;  %p1103_p5 = por %p1102_p4, %p1101_p11 }
  0x27   : > { %p1104_p7 = pnand %p1103_p5, %p1097_p12 }
  0x29   : > { %1107 = shalt.err (!%p1104_p7)
}
  0x2a   : > { %s1177_s21 = smov 128   ;;  %s1178_s22 = smov 8  }
  0x2b   : > { %1033 = dma.hbm_to_vmem [thread:$0]  (!%p1261_p13), %s1257_s25, 1024, %s1265_s27, %s1267_s29, %s1177_s21, %s1177_s21, %s1178_s22  }
  0x2c   : > { %p859_p9 = scmp.ge.s32.totalorder %s1174_s9, 1  ;;  %p106_p1 = scmp.lt.s32.totalorder %s1174_s9, 3 }
  0x2e   : > { %p107_p3 = pnand %p859_p9, %p106_p1 }
  0x2f   : > { %s1298_s23 = sand.u32 (!%p107_p3), 1, %s1166_s7  }
  0x30   : > { %110 = sbr.rel (%p107_p3) target bundleno = 320 (0x140), region = 24  ;;  %s860_s24 = sshll.u32 (!%p107_p3), %s1298_s23, 6 }
  0x31   : > { %s113_s26 = scalar_lea.sflag (!%p107_p3), [#allocation3], %s1298_s23  ;;  %s116_s30 = scalar_lea.vmem (!%p107_p3), [#allocation2], %s860_s24 }
  0x37   : > { %1153 = dma.done.wait (%p1237_p6), %s113_s26, 1024  }
  0x38   : > { %1155 = vsyncadd (%p1237_p6), %s113_s26, 4294966272  ;;  %v142_v0 = vlaneseq  ;;  %vm154_vm0 = vcmask 130048   ;;  %v1179_v5 = vmov 0.0   ;;  %v135_v9 = vld [vmem:[%s116_s30] ss:$2 sm:$0xff]  ;;  %vm755_vm4 = vcmask 64512  }
  0x39   : > { %v862_v10 = vld [vmem:[%s116_s30 + $0x10] ss:$2 sm:$0xff]  ;;  %v1180_v13 = vmov 1.0|1.0   ;;  %v156_v14 = vsel %vm154_vm0, %v135_v9, 0  ;;  %s134_s17 = scalar_lea.vmem [#allocation5], %s860_s24 }
  0x3a   : > { %v143_v1 = vshrl.u32 %v142_v0, 7  ;;  %v146_v2 = vand.u32 127, %v142_v0  ;;  %v159_v15 = vsel %vm154_vm0, %v862_v10, 0  ;;  %v863_v16 = vld [vmem:[%s116_s30 + $0x20] ss:$2 sm:$0xff]  ;;  %v234_v18 = vand.u32 4294901760, %v156_v14 }
  0x3b   : > { %v864_v17 = vld [vmem:[%s116_s30 + $0x30] ss:$2 sm:$0xff]  ;;  %v244_v19 = vand.u32 4294901760, %v159_v15  ;;  %v162_v20 = vsel %vm154_vm0, %v863_v16, 0  ;;  %756 = vst.msk [vmem:[%s134_s17] sm:$0xff] %vm755_vm4, %v1179_v5  ;;  %757 = vst.msk [vmem:[%s134_s17 + $0x8] sm:$0xff] %vm755_vm4, %v1179_v5 }
  0x3c   : > { %v144_v3 = vadd.s32 8, %v143_v1  ;;  %v147_v4 = vmul.u32 2, %v146_v2  ;;  %v165_v21 = vsel %vm154_vm0, %v864_v17, 0  ;;  %v254_v24 = vand.u32 4294901760, %v162_v20  ;;  %877 = vst.msk [vmem:[%s134_s17 + $0x30] sm:$0xff] %vm755_vm4, %v1179_v5  ;;  %878 = vst.msk [vmem:[%s134_s17 + $0x38] sm:$0xff] %vm755_vm4, %v1179_v5 }
  0x3d   : > { %v264_v25 = vand.u32 4294901760, %v165_v21  ;;  %v235_v26 = vsub.f32 %v156_v14, %v234_v18  ;;  %v245_v27 = vsub.f32 %v159_v15, %v244_v19  ;;  %s885_s25 = sshll.u32 %s1215_s10, 10  ;;  %s780_s27 = sshll.u32 %s134_s17, 4  ;;  %s1348_s27 = int_to_ptr.vmem [resolvable:$true] %s780_s27 }
  0x3e   : > { %vm148_vm1 = vcmp.eq.s32.totalorder %v143_v1, %v147_v4  ;;  %vm149_vm2 = vcmp.eq.s32.totalorder %v144_v3, %v147_v4  ;;  %v255_v30 = vsub.f32 %v162_v20, %v254_v24  ;;  %s1346_s2 = scalar_lea.hbm %s1395_s1, %s885_s25  ;;  %s767_s10 = scalar_lea.sflag [#allocation4], %s1298_s23 }
  0x3f   : > { %v865_v6 = vsel %vm148_vm1, 1.0, %v1179_v5  ;;  %v866_v7 = vsel %vm149_vm2, 1.0, %v1179_v5  ;;  %vm1310_vm3 = vmpackc.low %vm149_vm2, %vm148_vm1  ;;  %v236_v32 = vand.u32 4294901760, %v235_v26  ;;  %v246_v33 = vand.u32 4294901760, %v245_v27  ;;  %s1108_s3 = scalar_lea.vmem %s1348_s27, 1024  ;;  %p1404_p11 = scmp.ne.s32.totalorder %s1399_s18, 0 }
  0x40   : > { %v276_v11 = vsub.f32 %v865_v6, %v865_v6  ;;  %v283_v12 = vsub.f32 %v866_v7, %v866_v7  ;;  %995 = vmatprep.subr.msk.bf16.mxu0 %vm1310_vm3, %v1180_v13  ;;  %983 = vmatprep.subr.msk.bf16.mxu1 %vm1310_vm3, %v1180_v13  ;;  %v265_v34 = vsub.f32 %v165_v21, %v264_v25  ;;  %v256_v37 = vand.u32 4294901760, %v255_v30  ;;  %p1109_p6 = scmp.ne.s32.totalorder %s1348_s27, %s1108_s3  ;;  %s1181_s4 = smov [#allocation5]  }
  0x41   : > { %997 = vmatpush3.bf16.msk.msra.mxu0 %vm1310_vm3, %v1180_v13  ;;  %985 = vmatpush3.bf16.msk.msra.mxu1 %vm1310_vm3, %v1180_v13  ;;  %v237_v38 = vsub.f32 %v235_v26, %v236_v32  ;;  %v247_v39 = vsub.f32 %v245_v27, %v246_v33  ;;  %s1112_s5 = sshll.u32 %s1181_s4, 4  ;;  %s1113_s5 = int_to_ptr.vmem [resolvable:$false] %s1112_s5 }
  0x42   : > { %v277_v22 = vand.u32 4294901760, %v276_v11  ;;  %v284_v23 = vand.u32 4294901760, %v283_v12  ;;  %956 = vmatprep.mubr.f32.mxu0 %v236_v32  ;;  %v266_v40 = vand.u32 4294901760, %v265_v34  ;;  %v257_v42 = vsub.f32 %v255_v30, %v256_v37  ;;  %p1110_p12 = pnand %p1109_p6, %p1404_p11  ;;  %s1114_s11 = scalar_lea.vmem %s1113_s5, 2048 }
  0x43   : > { %v238_v43 = vand.u32 4294901760, %v237_v38  ;;  %v248_v44 = vand.u32 4294901760, %v247_v39  ;;  %v990_v47 = vpack.c.bf16 %v283_v12, %v276_v11  ;;  %p1115_p8 = scmp.lt.s32.totalorder %s1348_s27, %s1113_s5  ;;  %p1116_p10 = scmp.lt.s32.totalorder %s1114_s11, %s1108_s3 }
  0x44   : > { %v278_v28 = vsub.f32 %v276_v11, %v277_v22  ;;  %v285_v29 = vsub.f32 %v283_v12, %v284_v23  ;;  %v998_v31 = vpack.c.bf16 %v284_v23, %v277_v22  ;;  %957 = vmatmul.mubr.f32.vlgmr.msra.gmra.mrb[0].mxu0 %v246_v33  ;;  %v267_v45 = vsub.f32 %v265_v34, %v266_v40  ;;  %p1111_p13 = pneg %p1110_p12 }
  0x45   : > { %959 = vmatprep.mubr.f32.mxu0 %v256_v37  ;;  %v258_v46 = vand.u32 4294901760, %v257_v42  ;;  %926 = vmatprep.mubr.f32.mxu1 %v238_v43  ;;  %p1117_p0 = por %p1116_p10, %p1115_p8 }
  0x46   : > { %v279_v35 = vand.u32 4294901760, %v278_v28  ;;  %v286_v36 = vand.u32 4294901760, %v285_v29  ;;  %999 = vmatprep.subr.bf16.mxu0 %v998_v31  ;;  %927 = vmatmul.mubr.f32.vlgmr.msra.gmra.mrb[0].mxu1 %v248_v44  ;;  %v268_v48 = vand.u32 4294901760, %v267_v45 }
  0x47   : > { %1001 = vmatpush3.bf16.msra.mxu0 %v998_v31  ;;  %929 = vmatprep.mubr.f32.mxu1 %v258_v46  ;;  %p1118_p2 = pnand %p1117_p0, %p1111_p13 }
  0x48   : > { %v986_v41 = vpack.c.bf16 %v286_v36, %v279_v35  ;;  %1003 = vmatprep.subr.msk.bf16.mxu0 %vm1310_vm3, %v1180_v13  ;;  %960 = vmatmul.mubr.f32.gmra.mrb[2].mxu0 %v266_v40 }
  0x49   : > { %966 = vmatprep.mubr.f32.mxu0 %v234_v18 }
  0x4a   : > { %987 = vmatprep.subr.bf16.mxu1 %v986_v41  ;;  %930 = vmatmul.mubr.f32.gmra.mrb[2].mxu1 %v268_v48 }
  0x4b   : > { %989 = vmatpush3.bf16.msra.mxu1 %v986_v41  ;;  %936 = vmatprep.mubr.f32.mxu1 %v234_v18 }
  0x4c   : > { %991 = vmatprep.subr.bf16.mxu1 %v990_v47  ;;  %967 = vmatmul.mubr.f32.vlgmr.msra.gmra.mrb[0].mxu0 %v244_v19 }
  0x4d   : > { %969 = vmatprep.mubr.f32.mxu0 %v254_v24  ;;  %1005 = vmatpush3.bf16.msk.msra.mxu0 %vm1310_vm3, %v1180_v13 }
  0x4e   : > { %937 = vmatmul.mubr.f32.vlgmr.msra.gmra.mrb[0].mxu1 %v244_v19 }
  0x4f   : > { %993 = vmatpush3.bf16.msra.mxu1 %v990_v47  ;;  %939 = vmatprep.mubr.f32.mxu1 %v254_v24 }
  0x50   : > { %970 = vmatmul.mubr.f32.gmra.mrb[2].mxu0 %v264_v25 }
  0x51   : > { %976 = vmatprep.mubr.f32.mxu0 %v234_v18 }
  0x52   : > { %940 = vmatmul.mubr.f32.gmra.mrb[2].mxu1 %v264_v25 }
  0x53   : > { %946 = vmatprep.mubr.f32.mxu1 %v235_v26 }
  0x54   : > { %977 = vmatmul.mubr.f32.vlgmr.msra.gmra.mrb[0].mxu0 %v244_v19 }
  0x55   : > { %979 = vmatprep.mubr.f32.mxu0 %v254_v24 }
  0x56   : > { %947 = vmatmul.mubr.f32.vlgmr.msra.gmra.mrb[0].mxu1 %v245_v27 }
  0x57   : > { %949 = vmatprep.mubr.f32.mxu1 %v255_v30 }
  0x58   : > { %980 = vmatmul.mubr.f32.gmra.mrb[2].mxu0 %v264_v25 }
  0x5a   : > { %950 = vmatmul.mubr.f32.gmra.mrb[2].mxu1 %v265_v34 }
 0x127   : > { %v978_v49 = vpop.f32.mrb[0].mxu0 }
 0x128   : > { %v733_v50 = vpop.f32.mrb[1].mxu0 }
 0x129   : > { %v948_v51 = vpop.f32.mrb[0].mxu1 }
 0x12a   : > { %v1006_v53 = vadd.f32 %v978_v49, %v948_v51  ;;  %v445_v54 = vpop.f32.mrb[1].mxu1 }
 0x12b   : > { %v981_v52 = vpop.f32.mrb[2].mxu0  ;;  %v1007_v56 = vadd.f32 %v733_v50, %v445_v54 }
 0x12c   : > { %v745_v55 = vpop.f32.mrb[3].mxu0  ;;  %874 = vst.msk [vmem:[%s134_s17 + $0x18] sm:$0xff] %vm755_vm4, %v1006_v53 }
 0x12d   : > { %873 = vst.msk [vmem:[%s134_s17 + $0x10] sm:$0xff] %vm755_vm4, %v1007_v56  ;;  %v951_v57 = vpop.f32.mrb[2].mxu1 }
 0x12e   : > { %v1008_v58 = vadd.f32 %v981_v52, %v951_v57  ;;  %v459_v59 = vpop.f32.mrb[3].mxu1 }
 0x12f   : > { %v1009_v60 = vadd.f32 %v745_v55, %v459_v59 }
 0x130   : > { %876 = vst.msk [vmem:[%s134_s17 + $0x28] sm:$0xff] %vm755_vm4, %v1008_v58 }
 0x131   : > { %875 = vst.msk [vmem:[%s134_s17 + $0x20] sm:$0xff] %vm755_vm4, %v1009_v60 }
 0x132   : > { %1121 = shalt.err (!%p1118_p2)
}
 0x133   : > { %s1122_s13 = scalar_lea.hbm %s1346_s2, 1024  ;;  %s1126_s20 = scalar_lea.hbm %s1395_s1, 2048 }
 0x134   : > { %p1123_p4 = scmp.ne.s32.totalorder %s1346_s2, %s1122_s13  ;;  %p1127_p9 = scmp.lt.u32.totalorder %s1346_s2, %s1395_s1 }
 0x135   : > { %p1128_p1 = scmp.lt.u32.totalorder %s1126_s20, %s1122_s13  ;;  %p1130_p6 = scmp.lt.u32.totalorder %s1122_s13, %s1346_s2 }
 0x136   : > { %p1124_p5 = pnand %p1123_p4, %p1404_p11 }
 0x137   : > { %p1129_p3 = por %p1128_p1, %p1127_p9 }
 0x138   : > { %p1125_p7 = pneg %p1124_p5 }
 0x139   : > { %p1131_p12 = por %p1130_p6, %p1129_p3 }
 0x13b   : > { %p1132_p13 = pnand %p1131_p12, %p1125_p7 }
 0x13d   : > { %1135 = shalt.err (!%p1132_p13)
}
 0x13e   : > { %s1182_s24 = smov 128   ;;  %s1183_s26 = smov 8  }
 0x13f   : > { %1028 = dma.vmem_to_hbm [thread:$0]  (%p1404_p11), %s1348_s27, 1024, %s1346_s2, %s767_s10, %s1182_s24, %s1182_s24, %s1183_s26  }
 0x140 PF: > { %s795_s30 = sand.u32 1, %s1162_s6   ;;  %p1405_p8 = scmp.ne.s32.totalorder %s1400_s19, 0 }
 0x141   : > { %p1406_p10 = scmp.ge.s32.totalorder %s1174_s9, 2  ;;  %s796_s17 = scalar_lea.sflag [#allocation4], %s795_s30 }
 0x143   : > { %p1035_p0 = pnand %p1406_p10, %p1405_p8 }
 0x145   : > { %1157 = dma.done.wait (!%p1035_p0), %s796_s17, 1024  }
 0x146   : > { %1159 = vsyncadd (!%p1035_p0), %s796_s17, 4294966272  ;;  %p14_p2 = scmp.ge.s32.totalorder %s1219_s12, 4   ;;  %s1407_s6 = smov %s1166_s7 }
 0x147   : > { %s1408_s7 = smov %s1170_s8  ;;  %s1409_s8 = smov %s1231_s15 }
 0x148   : > { %s1410_s9 = smov %s1219_s12  ;;  %16 = sbr.rel (!%p14_p2) target bundleno = 5 (0x5), region = 74 }
 0x14f   :  { %801 = vsyncpa [#allocation3], 1 }
 0x150   :  { %803 = vsyncpa [#allocation3 + $0x1], 1 }
 0x151   :  { %804 = vsyncpa [#allocation4], 1 }
 0x152   :  { %806 = vsyncpa [#allocation4 + $0x1], 1 }

</bundles_post_ra>
